<compile_context>
chip_gen: v7x
topology: tpu7x:2x2x1
jax: 0.10.0
libtpu: 0.0.40
codegen_flags: <defaults>
</compile_context>

<pallas_src>
import functools

import jax
import jax.numpy as jnp
from jax import lax
from jax.experimental import pallas as pl
from jax.experimental.pallas import tpu as pltpu

_LANE = 128      # feature dims padded to multiples of this (lane-dense stores)
_SUBLANE = 16    # batch-tile alignment (bf16-friendly sublane packing)


def _round_up(n, m):
    return ((n + m - 1) // m) * m


def _pad2d(a, rows, cols):
    r, c = a.shape
    if r == rows and c == cols:
        return a
    return jnp.pad(a, ((0, rows - r), (0, cols - c)))


def _batch_tiling(B, batch_tile):
    """Pick (tm, Bp, ntiles): bounded padding waste, >=2 grid steps when worthwhile."""
    ntiles = pl.cdiv(B, batch_tile)
    tm = _round_up(pl.cdiv(B, ntiles), _SUBLANE)
    # Guarantee >=2 grid iterations (v7x megacore) when the tile is big enough to split.
    if ntiles < 2 and tm >= 2 * _SUBLANE:
        tm = _round_up(tm // 2, _SUBLANE)
    ntiles = pl.cdiv(B, tm)
    return tm, tm * ntiles, ntiles


def _invariant_spec(shape, single_buffer):
    """BlockSpec for a grid-invariant operand (index_map constant across the grid)."""
    if single_buffer:
        # No need to double-buffer an operand that never changes across grid steps.
        return pl.BlockSpec(shape, lambda i: (0, 0), pipeline_mode=pl.Buffered(1))
    return pl.BlockSpec(shape, lambda i: (0, 0))


def _vmem_limit(*byte_counts):
    need = sum(int(b) for b in byte_counts)
    return int(min(max(int(need * 1.5), 8 << 20), 64 << 20))


def _pallas_fc_call(kernel, args, build_specs, out_shape, grid, vmem_limit_bytes):
    """Run pallas_call; fall back to default double-buffering if Buffered(1) is rejected."""
    last_err = None
    for single_buffer in (True, False):
        try:
            in_specs, out_spec = build_specs(single_buffer)
            fn = pl.pallas_call(
                kernel,
                out_shape=out_shape,
                grid=grid,
                in_specs=in_specs,
                out_specs=out_spec,
                compiler_params=pltpu.CompilerParams(
                    dimension_semantics=("parallel",),
                    vmem_limit_bytes=vmem_limit_bytes),
            )
            return jax.block_until_ready(fn(*args))
        except Exception as err:  # noqa: BLE001 - retry without pipeline_mode=Buffered(1)
            last_err = err
    raise last_err


def _softmax_lanes(y, valid_cols):
    """Numerically-stable softmax over the first `valid_cols` lanes of an f32 tile."""
    if valid_cols != y.shape[1]:          # trace-time: skip mask when lanes are unpadded
        col = lax.broadcasted_iota(jnp.int32, y.shape, 1)
        y = jnp.where(col < valid_cols, y, -1e30)   # padded lanes contribute exp ~ 0
    m = jnp.max(y, axis=1, keepdims=True)
    e = jnp.exp(y - m)
    denom = jnp.sum(e, axis=1, keepdims=True)
    return e * pl.reciprocal(denom, approx=True)    # EUP slot instead of VPU divide


# ---------------------------------------------------------------------------
# Single FullConnectLayer kernel (module-faithful): Linear -> Activate -> Dropout
# ---------------------------------------------------------------------------
def _fc_kernel(x_ref, w_ref, b_ref, *rest, output_layer, valid_cols,
               has_dropout, drop_scale):
    if has_dropout:
        m_ref, o_ref = rest
    else:
        (o_ref,) = rest
    # (tm, K) @ (K, N) on the MXU; bf16 operands, f32 accumulation.
    y = jnp.dot(x_ref[...], w_ref[...], preferred_element_type=jnp.float32)
    y = y + b_ref[...]
    if output_layer:
        y = _softmax_lanes(y, valid_cols)
    else:
        y = jnp.maximum(y, 0.0)
    if has_dropout:
        # Un-scaled 0/1 keep mask streamed in bf16; scale applied here in f32.
        y = y * (m_ref[...].astype(jnp.float32) * drop_scale)
    o_ref[...] = y.astype(o_ref.dtype)


def full_connect_layer(x, weight, bias, *, drop_p=0.0, output_layer=False,
                       dropout_key=None, batch_tile=512,
                       compute_dtype=jnp.bfloat16, out_dtype=jnp.float32):
    """Pallas equivalent of FullConnectLayer.forward (training-mode dropout).

    x:(B,K) f32, weight:(N,K) torch layout, bias:(N,)
    """
    B, K = x.shape
    N, K2 = weight.shape
    assert K == K2
    drop_p = float(drop_p)

    Kp = _round_up(K, _LANE)
    Np = _round_up(N, _LANE)
    tm, Bp, ntiles = _batch_tiling(B, batch_tile)
    cbytes = jnp.dtype(compute_dtype).itemsize

    x_p = _pad2d(x.astype(jnp.float32), Bp, Kp).astype(compute_dtype)
    # One-time wrapper transpose (amortized by XLA) -> plain (tm,K)@(K,N) in the kernel.
    w_t = _pad2d(weight.astype(jnp.float32), Np, Kp).T.astype(compute_dtype)   # (Kp, Np)
    b_p = _pad2d(bias.reshape(1, N).astype(jnp.float32), 1, Np)                # f32 bias

    has_dropout = drop_p > 0.0
    args = [x_p, w_t, b_p]
    if has_dropout:
        if dropout_key is None:
            dropout_key = jax.random.PRNGKey(0)
        keep = jax.random.bernoulli(dropout_key, 1.0 - drop_p, (Bp, Np))
        args.append(keep.astype(compute_dtype))       # 0/1 mask, scaled in-kernel

    def build_specs(single_buffer):
        inv = lambda shape: _invariant_spec(shape, single_buffer)
        in_specs = [pl.BlockSpec((tm, Kp), lambda i: (i, 0)),
                    inv((Kp, Np)),
                    inv((1, Np))]
        if has_dropout:
            in_specs.append(pl.BlockSpec((tm, Np), lambda i: (i, 0)))
        return in_specs, pl.BlockSpec((tm, Np), lambda i: (i, 0))

    vmem_bytes = _vmem_limit(
        2 * tm * Kp * cbytes,                       # x tile (double-buffered)
        2 * (Kp * Np * cbytes + Np * 4),            # weight + bias (upper bound)
        (2 * tm * Np * cbytes) if has_dropout else 0,
        2 * tm * Np * jnp.dtype(out_dtype).itemsize,
        tm * Np * 4,                                # f32 intermediates headroom
    )

    kernel = functools.partial(
        _fc_kernel, output_layer=bool(output_layer), valid_cols=N,
        has_dropout=has_dropout,
        drop_scale=(1.0 / (1.0 - drop_p)) if has_dropout else 1.0)

    out = _pallas_fc_call(kernel, args, build_specs,
                          jax.ShapeDtypeStruct((Bp, Np), out_dtype),
                          (ntiles,), vmem_bytes)
    return out[:B, :N]


# ---------------------------------------------------------------------------
# Fused two-layer MLP: (Linear -> ReLU -> Dropout) -> (Linear -> Softmax(dim=1))
# One pallas_call; hidden activation stays on-chip.
# ---------------------------------------------------------------------------
def _fused_mlp_kernel(*refs, valid_out, has_dropout, drop_scale):
    if has_dropout:
        x_ref, w1_ref, b1_ref, m_ref, w2_ref, b2_ref, o_ref = refs
    else:
        x_ref, w1_ref, b1_ref, w2_ref, b2_ref, o_ref = refs
        m_ref = None

    h = jnp.dot(x_ref[...], w1_ref[...], preferred_element_type=jnp.float32)
    h = jnp.maximum(h + b1_ref[...], 0.0)                 # ReLU
    if has_dropout:
        h = h * (m_ref[...].astype(jnp.float32) * drop_scale)
    h = h.astype(w2_ref.dtype)                            # back to bf16 for second MXU pass

    y = jnp.dot(h, w2_ref[...], preferred_element_type=jnp.float32)
    y = y + b2_ref[...]
    y = _softmax_lanes(y, valid_out)                      # Softmax(dim=1)
    o_ref[...] = y.astype(o_ref.dtype)


def fused_mlp(x, w1, b1, w2, b2, *, drop_p=0.0, dropout_key=None, batch_tile=512,
              compute_dtype=jnp.bfloat16, out_dtype=jnp.float32):
    """Two stacked FullConnectLayers fused into a single Pallas kernel.

    Returns (output, scaled_keep_mask) where the mask is the padded, pre-scaled (f32)
    keep mask actually applied (None when drop_p == 0).
    """
    B, K = x.shape
    H = w1.shape[0]
    N = w2.shape[0]
    drop_p = float(drop_p)

    Kp, Hp, Np = (_round_up(d, _LANE) for d in (K, H, N))
    tm, Bp, ntiles = _batch_tiling(B, batch_tile)
    cbytes = jnp.dtype(compute_dtype).itemsize

    x_p = _pad2d(x.astype(jnp.float32), Bp, Kp).astype(compute_dtype)
    w1_t = _pad2d(w1.astype(jnp.float32), Hp, Kp).T.astype(compute_dtype)   # (Kp, Hp)
    b1_p = _pad2d(b1.reshape(1, H).astype(jnp.float32), 1, Hp)
    w2_t = _pad2d(w2.astype(jnp.float32), Np, Hp).T.astype(compute_dtype)   # (Hp, Np)
    b2_p = _pad2d(b2.reshape(1, N).astype(jnp.float32), 1, Np)

    has_dropout = drop_p > 0.0
    mask_scaled = None
    args = [x_p, w1_t, b1_p]
    if has_dropout:
        if dropout_key is None:
            dropout_key = jax.random.PRNGKey(0)
        keep = jax.random.bernoulli(dropout_key, 1.0 - drop_p, (Bp, Hp))
        mask_scaled = keep.astype(jnp.float32) * (1.0 / (1.0 - drop_p))
        args.append(keep.astype(compute_dtype))      # stream un-scaled 0/1 in bf16
    args += [w2_t, b2_p]

    def build_specs(single_buffer):
        inv = lambda shape: _invariant_spec(shape, single_buffer)
        in_specs = [pl.BlockSpec((tm, Kp), lambda i: (i, 0)),
                    inv((Kp, Hp)),
                    inv((1, Hp))]
        if has_dropout:
            in_specs.append(pl.BlockSpec((tm, Hp), lambda i: (i, 0)))
        in_specs += [inv((Hp, Np)), inv((1, Np))]
        return in_specs, pl.BlockSpec((tm, Np), lambda i: (i, 0))

    vmem_bytes = _vmem_limit(
        2 * tm * Kp * cbytes,
        2 * (Kp * Hp * cbytes + Hp * 4),
        2 * (Hp * Np * cbytes + Np * 4),
        (2 * tm * Hp * cbytes) if has_dropout else 0,
        2 * tm * Np * jnp.dtype(out_dtype).itemsize,
        tm * (Hp + Np) * 4,
    )

    kernel = functools.partial(
        _fused_mlp_kernel, valid_out=N, has_dropout=has_dropout,
        drop_scale=(1.0 / (1.0 - drop_p)) if has_dropout else 1.0)

    out = _pallas_fc_call(kernel, args, build_specs,
                          jax.ShapeDtypeStruct((Bp, Np), out_dtype),
                          (ntiles,), vmem_bytes)
    return out[:B, :N], mask_scaled


def _init_linear_params(key, in_features, out_features):
    """Deterministic init mimicking torch.nn.Linear default (uniform +-1/sqrt(fan_in))."""
    kw, kb = jax.random.split(key)
    bound = 1.0 / jnp.sqrt(jnp.float32(in_features))
    weight = jax.random.uniform(
        kw, (out_features, in_features), jnp.float32, minval=-bound, maxval=bound)
    bias = jax.random.uniform(
        kb, (out_features,), jnp.float32, minval=-bound, maxval=bound)
    return weight, bias


if __name__ == "__main__":
    key = jax.random.PRNGKey(0)
    k_x, k_p1, k_p2, k_drop = jax.random.split(key, 4)

    B, in_features, hidden, out_features = 8, 32, 16, 16
    x = jax.random.normal(k_x, (B, in_features), dtype=jnp.float32)

    w1, b1 = _init_linear_params(k_p1, in_features, hidden)
    w2, b2 = _init_linear_params(k_p2, hidden, out_features)

    # Fused path: (Linear -> ReLU -> Dropout(0.5)) -> (Linear -> Softmax(dim=1)).
    y, mask = fused_mlp(x, w1, b1, w2, b2, drop_p=0.5, dropout_key=k_drop)
    y = jax.block_until_ready(y)

    # Pure-JAX reference: f32 math on bf16-rounded operands (= what the bf16-MXU path
    # computes), using the exact same dropout keep mask.
    q = lambda a: a.astype(jnp.bfloat16).astype(jnp.float32)
    h_relu_ref = jnp.maximum(q(x) @ q(w1).T + b1, 0.0)
    h_drop_ref = h_relu_ref * mask[:B, :hidden]
    y_ref = jax.nn.softmax(q(h_drop_ref) @ q(w2).T + b2, axis=1)

    # Standalone single-layer (module-faithful) kernel checks.
    h_relu = full_connect_layer(x, w1, b1, drop_p=0.0, output_layer=False)
    h_drop = full_connect_layer(x, w1, b1, drop_p=0.5, output_layer=False,
                                dropout_key=k_drop)
    y_single = full_connect_layer(h_drop_ref, w2, b2, drop_p=0.0, output_layer=True)
    jax.block_until_ready((h_relu, h_drop, y_single))

    assert y.shape == (B, out_features)
    assert bool(jnp.all(h_relu >= 0.0))
    # Softmax rows sum to ~1 (approx reciprocal on the denominator -> looser tolerance).
    assert bool(jnp.all(jnp.abs(jnp.sum(y, axis=1) - 1.0) < 1e-2))
    assert bool(jnp.allclose(h_relu, h_relu_ref, atol=2e-3, rtol=2e-3))
    assert bool(jnp.allclose(h_drop, h_drop_ref, atol=2e-3, rtol=2e-3))
    assert bool(jnp.allclose(y_single, y_ref, atol=2e-2, rtol=2e-2))
    assert bool(jnp.allclose(y, y_ref, atol=2e-2, rtol=2e-2))

    print("KERNEL_OK")
</pallas_src>

<mosaic_0001>
module attributes {stable_mosaic.version = 11 : i64} {
  func.func @_fused_mlp_kernel(%arg0: i32, %arg1: memref<16x128xbf16, #tpu.memory_space<vmem>>, %arg2: memref<128x128xbf16, #tpu.memory_space<vmem>>, %arg3: memref<1x128xf32, #tpu.memory_space<vmem>>, %arg4: memref<16x128xbf16, #tpu.memory_space<vmem>>, %arg5: memref<128x128xbf16, #tpu.memory_space<vmem>>, %arg6: memref<1x128xf32, #tpu.memory_space<vmem>>, %arg7: memref<16x128xf32, #tpu.memory_space<vmem>>) attributes {dimension_semantics = [#tpu.dimension_semantics<parallel>], iteration_bounds = array<i64: 1>, scalar_prefetch = 0 : i64, scratch_operands = 0 : i64, tpu.core_type = #tpu.core_type<tc>, window_params = [{transform_indices = @transform_0, window_bounds = array<i64: 16, 128>}, {pipeline_mode = #tpu.pipeline_mode<synchronous>, transform_indices = @transform_1, window_bounds = array<i64: 128, 128>}, {pipeline_mode = #tpu.pipeline_mode<synchronous>, transform_indices = @transform_2, window_bounds = array<i64: 1, 128>}, {transform_indices = @transform_3, window_bounds = array<i64: 16, 128>}, {pipeline_mode = #tpu.pipeline_mode<synchronous>, transform_indices = @transform_4, window_bounds = array<i64: 128, 128>}, {pipeline_mode = #tpu.pipeline_mode<synchronous>, transform_indices = @transform_5, window_bounds = array<i64: 1, 128>}, {transform_indices = @transform_6, window_bounds = array<i64: 16, 128>}]} {
    %c0 = arith.constant 0 : index
    %c0_0 = arith.constant 0 : index
    %0 = vector.load %arg1[%c0, %c0_0] : memref<16x128xbf16, #tpu.memory_space<vmem>>, vector<16x128xbf16>
    %c0_1 = arith.constant 0 : index
    %c0_2 = arith.constant 0 : index
    %1 = vector.load %arg2[%c0_1, %c0_2] : memref<128x128xbf16, #tpu.memory_space<vmem>>, vector<128x128xbf16>
    %cst = arith.constant dense<0.000000e+00> : vector<16x128xf32>
    %2 = tpu.matmul %0, %1, %cst {dimension_numbers = #tpu.dot_dimension_numbers<[1], [0], [0], [1], [0, 0, 1, 1], [], []>} : vector<16x128xbf16>, vector<128x128xbf16>, vector<16x128xf32> -> vector<16x128xf32>
    %c0_3 = arith.constant 0 : index
    %c0_4 = arith.constant 0 : index
    %3 = vector.load %arg3[%c0_3, %c0_4] : memref<1x128xf32, #tpu.memory_space<vmem>>, vector<1x128xf32>
    %4 = vector.broadcast %3 : vector<1x128xf32> to vector<16x128xf32>
    %5 = arith.addf %2, %4 : vector<16x128xf32>
    %cst_5 = arith.constant 0.000000e+00 : f32
    %6 = vector.broadcast %cst_5 : f32 to vector<16x128xf32>
    %7 = arith.maximumf %5, %6 : vector<16x128xf32>
    %c0_6 = arith.constant 0 : index
    %c0_7 = arith.constant 0 : index
    %8 = vector.load %arg4[%c0_6, %c0_7] : memref<16x128xbf16, #tpu.memory_space<vmem>>, vector<16x128xbf16>
    %9 = arith.extf %8 : vector<16x128xbf16> to vector<16x128xf32>
    %cst_8 = arith.constant 2.000000e+00 : f32
    %10 = vector.broadcast %cst_8 : f32 to vector<16x128xf32>
    %11 = arith.mulf %9, %10 : vector<16x128xf32>
    %12 = arith.mulf %7, %11 : vector<16x128xf32>
    %13 = arith.truncf %12 : vector<16x128xf32> to vector<16x128xbf16>
    %c0_9 = arith.constant 0 : index
    %c0_10 = arith.constant 0 : index
    %14 = vector.load %arg5[%c0_9, %c0_10] : memref<128x128xbf16, #tpu.memory_space<vmem>>, vector<128x128xbf16>
    %cst_11 = arith.constant dense<0.000000e+00> : vector<16x128xf32>
    %15 = tpu.matmul %13, %14, %cst_11 {dimension_numbers = #tpu.dot_dimension_numbers<[1], [0], [0], [1], [0, 0, 1, 1], [], []>} : vector<16x128xbf16>, vector<128x128xbf16>, vector<16x128xf32> -> vector<16x128xf32>
    %c0_12 = arith.constant 0 : index
    %c0_13 = arith.constant 0 : index
    %16 = vector.load %arg6[%c0_12, %c0_13] : memref<1x128xf32, #tpu.memory_space<vmem>>, vector<1x128xf32>
    %17 = vector.broadcast %16 : vector<1x128xf32> to vector<16x128xf32>
    %18 = arith.addf %15, %17 : vector<16x128xf32>
    %19 = tpu.iota {dimensions = array<i32: 1>} : vector<16x128xi32>
    %c16_i32 = arith.constant 16 : i32
    %20 = vector.broadcast %c16_i32 : i32 to vector<16x128xi32>
    %21 = arith.cmpi slt, %19, %20 : vector<16x128xi32>
    %cst_14 = arith.constant -1.000000e+30 : f32
    %22 = vector.broadcast %cst_14 : f32 to vector<16x128xf32>
    %23 = arith.select %21, %18, %22 : vector<16x128xi1>, vector<16x128xf32>
    %cst_15 = arith.constant dense<0xFF800000> : vector<16xf32>
    %24 = vector.multi_reduction <maximumf>, %23, %cst_15 [1] : vector<16x128xf32> to vector<16xf32>
    %25 = vector.shape_cast %24 : vector<16xf32> to vector<16x1xf32>
    %26 = vector.broadcast %25 : vector<16x1xf32> to vector<16x128xf32>
    %27 = arith.subf %23, %26 : vector<16x128xf32>
    %28 = math.exp %27 : vector<16x128xf32>
    %cst_16 = arith.constant dense<0.000000e+00> : vector<16xf32>
    %29 = vector.multi_reduction <add>, %28, %cst_16 [1] : vector<16x128xf32> to vector<16xf32>
    %30 = vector.shape_cast %29 : vector<16xf32> to vector<16x1xf32>
    %31 = tpu.reciprocal %30 {approx = true} : vector<16x1xf32> -> vector<16x1xf32>
    %32 = vector.broadcast %31 : vector<16x1xf32> to vector<16x128xf32>
    %33 = arith.mulf %28, %32 : vector<16x128xf32>
    %c0_17 = arith.constant 0 : index
    %c0_18 = arith.constant 0 : index
    %34 = vector.load %arg7[%c0_17, %c0_18] : memref<16x128xf32, #tpu.memory_space<vmem>>, vector<16x128xf32>
    tpu.vector_store %arg7[%c0_17, %c0_18], %33 {strides = array<i32>} : memref<16x128xf32, #tpu.memory_space<vmem>>, vector<16x128xf32>,
    return
  }
  func.func @transform_0(%arg0: i32) -> (i32, i32) {
    %c0_i32 = arith.constant 0 : i32
    %c0_i32_0 = arith.constant 0 : i32
    return %arg0, %c0_i32 : i32, i32
  }
  func.func @transform_1(%arg0: i32) -> (i32, i32) {
    %c0_i32 = arith.constant 0 : i32
    %c0_i32_0 = arith.constant 0 : i32
    %c0_i32_1 = arith.constant 0 : i32
    return %c0_i32, %c0_i32_0 : i32, i32
  }
  func.func @transform_2(%arg0: i32) -> (i32, i32) {
    %c0_i32 = arith.constant 0 : i32
    %c0_i32_0 = arith.constant 0 : i32
    %c0_i32_1 = arith.constant 0 : i32
    return %c0_i32, %c0_i32_0 : i32, i32
  }
  func.func @transform_3(%arg0: i32) -> (i32, i32) {
    %c0_i32 = arith.constant 0 : i32
    %c0_i32_0 = arith.constant 0 : i32
    return %arg0, %c0_i32 : i32, i32
  }
  func.func @transform_4(%arg0: i32) -> (i32, i32) {
    %c0_i32 = arith.constant 0 : i32
    %c0_i32_0 = arith.constant 0 : i32
    %c0_i32_1 = arith.constant 0 : i32
    return %c0_i32, %c0_i32_0 : i32, i32
  }
  func.func @transform_5(%arg0: i32) -> (i32, i32) {
    %c0_i32 = arith.constant 0 : i32
    %c0_i32_0 = arith.constant 0 : i32
    %c0_i32_1 = arith.constant 0 : i32
    return %c0_i32, %c0_i32_0 : i32, i32
  }
  func.func @transform_6(%arg0: i32) -> (i32, i32) {
    %c0_i32 = arith.constant 0 : i32
    %c0_i32_0 = arith.constant 0 : i32
    return %arg0, %c0_i32 : i32, i32
  }
}

module attributes {stable_mosaic.version = 11 : i64} {
  func.func @_fused_mlp_kernel(%arg0: i32, %arg1: memref<16x128xbf16, #tpu.memory_space<vmem>>, %arg2: memref<128x128xbf16, #tpu.memory_space<vmem>>, %arg3: memref<1x128xf32, #tpu.memory_space<vmem>>, %arg4: memref<16x128xbf16, #tpu.memory_space<vmem>>, %arg5: memref<128x128xbf16, #tpu.memory_space<vmem>>, %arg6: memref<1x128xf32, #tpu.memory_space<vmem>>, %arg7: memref<16x128xf32, #tpu.memory_space<vmem>>) attributes {dimension_semantics = [#tpu.dimension_semantics<parallel>], iteration_bounds = array<i64: 1>, scalar_prefetch = 0 : i64, scratch_operands = 0 : i64, tpu.core_type = #tpu.core_type<tc>, window_params = [{transform_indices = @transform_0, window_bounds = array<i64: 16, 128>}, {pipeline_mode = #tpu.pipeline_mode<synchronous>, transform_indices = @transform_1, window_bounds = array<i64: 128, 128>}, {pipeline_mode = #tpu.pipeline_mode<synchronous>, transform_indices = @transform_2, window_bounds = array<i64: 1, 128>}, {transform_indices = @transform_3, window_bounds = array<i64: 16, 128>}, {pipeline_mode = #tpu.pipeline_mode<synchronous>, transform_indices = @transform_4, window_bounds = array<i64: 128, 128>}, {pipeline_mode = #tpu.pipeline_mode<synchronous>, transform_indices = @transform_5, window_bounds = array<i64: 1, 128>}, {transform_indices = @transform_6, window_bounds = array<i64: 16, 128>}]} {
    %c0 = arith.constant 0 : index
    %c0_0 = arith.constant 0 : index
    %0 = vector.load %arg1[%c0, %c0_0] : memref<16x128xbf16, #tpu.memory_space<vmem>>, vector<16x128xbf16>
    %c0_1 = arith.constant 0 : index
    %c0_2 = arith.constant 0 : index
    %1 = vector.load %arg2[%c0_1, %c0_2] : memref<128x128xbf16, #tpu.memory_space<vmem>>, vector<128x128xbf16>
    %cst = arith.constant dense<0.000000e+00> : vector<16x128xf32>
    %2 = tpu.matmul %0, %1, %cst {dimension_numbers = #tpu.dot_dimension_numbers<[1], [0], [0], [1], [0, 0, 1, 1], [], []>} : vector<16x128xbf16>, vector<128x128xbf16>, vector<16x128xf32> -> vector<16x128xf32>
    %c0_3 = arith.constant 0 : index
    %c0_4 = arith.constant 0 : index
    %3 = vector.load %arg3[%c0_3, %c0_4] : memref<1x128xf32, #tpu.memory_space<vmem>>, vector<1x128xf32>
    %4 = vector.broadcast %3 : vector<1x128xf32> to vector<16x128xf32>
    %5 = arith.addf %2, %4 : vector<16x128xf32>
    %cst_5 = arith.constant 0.000000e+00 : f32
    %6 = vector.broadcast %cst_5 : f32 to vector<16x128xf32>
    %7 = arith.maximumf %5, %6 : vector<16x128xf32>
    %c0_6 = arith.constant 0 : index
    %c0_7 = arith.constant 0 : index
    %8 = vector.load %arg4[%c0_6, %c0_7] : memref<16x128xbf16, #tpu.memory_space<vmem>>, vector<16x128xbf16>
    %9 = arith.extf %8 : vector<16x128xbf16> to vector<16x128xf32>
    %cst_8 = arith.constant 2.000000e+00 : f32
    %10 = vector.broadcast %cst_8 : f32 to vector<16x128xf32>
    %11 = arith.mulf %9, %10 : vector<16x128xf32>
    %12 = arith.mulf %7, %11 : vector<16x128xf32>
    %13 = arith.truncf %12 : vector<16x128xf32> to vector<16x128xbf16>
    %c0_9 = arith.constant 0 : index
    %c0_10 = arith.constant 0 : index
    %14 = vector.load %arg5[%c0_9, %c0_10] : memref<128x128xbf16, #tpu.memory_space<vmem>>, vector<128x128xbf16>
    %cst_11 = arith.constant dense<0.000000e+00> : vector<16x128xf32>
    %15 = tpu.matmul %13, %14, %cst_11 {dimension_numbers = #tpu.dot_dimension_numbers<[1], [0], [0], [1], [0, 0, 1, 1], [], []>} : vector<16x128xbf16>, vector<128x128xbf16>, vector<16x128xf32> -> vector<16x128xf32>
    %c0_12 = arith.constant 0 : index
    %c0_13 = arith.constant 0 : index
    %16 = vector.load %arg6[%c0_12, %c0_13] : memref<1x128xf32, #tpu.memory_space<vmem>>, vector<1x128xf32>
    %17 = vector.broadcast %16 : vector<1x128xf32> to vector<16x128xf32>
    %18 = arith.addf %15, %17 : vector<16x128xf32>
    %19 = tpu.iota {dimensions = array<i32: 1>} : vector<16x128xi32>
    %c16_i32 = arith.constant 16 : i32
    %20 = vector.broadcast %c16_i32 : i32 to vector<16x128xi32>
    %21 = arith.cmpi slt, %19, %20 : vector<16x128xi32>
    %cst_14 = arith.constant -1.000000e+30 : f32
    %22 = vector.broadcast %cst_14 : f32 to vector<16x128xf32>
    %23 = arith.select %21, %18, %22 : vector<16x128xi1>, vector<16x128xf32>
    %cst_15 = arith.constant dense<0xFF800000> : vector<16xf32>
    %24 = vector.multi_reduction <maximumf>, %23, %cst_15 [1] : vector<16x128xf32> to vector<16xf32>
    %25 = vector.shape_cast %24 : vector<16xf32> to vector<16x1xf32>
    %26 = vector.broadcast %25 : vector<16x1xf32> to vector<16x128xf32>
    %27 = arith.subf %23, %26 : vector<16x128xf32>
    %28 = math.exp %27 : vector<16x128xf32>
    %cst_16 = arith.constant dense<0.000000e+00> : vector<16xf32>
    %29 = vector.multi_reduction <add>, %28, %cst_16 [1] : vector<16x128xf32> to vector<16xf32>
    %30 = vector.shape_cast %29 : vector<16xf32> to vector<16x1xf32>
    %31 = tpu.reciprocal %30 {approx = true} : vector<16x1xf32> -> vector<16x1xf32>
    %32 = vector.broadcast %31 : vector<16x1xf32> to vector<16x128xf32>
    %33 = arith.mulf %28, %32 : vector<16x128xf32>
    %c0_17 = arith.constant 0 : index
    %c0_18 = arith.constant 0 : index
    %34 = vector.load %arg7[%c0_17, %c0_18] : memref<16x128xf32, #tpu.memory_space<vmem>>, vector<16x128xf32>
    tpu.vector_store %arg7[%c0_17, %c0_18], %33 {strides = array<i32>} : memref<16x128xf32, #tpu.memory_space<vmem>>, vector<16x128xf32>,
    return
  }
  func.func @transform_0(%arg0: i32) -> (i32, i32) {
    %c0_i32 = arith.constant 0 : i32
    %c0_i32_0 = arith.constant 0 : i32
    return %arg0, %c0_i32 : i32, i32
  }
  func.func @transform_1(%arg0: i32) -> (i32, i32) {
    %c0_i32 = arith.constant 0 : i32
    %c0_i32_0 = arith.constant 0 : i32
    %c0_i32_1 = arith.constant 0 : i32
    return %c0_i32, %c0_i32_0 : i32, i32
  }
  func.func @transform_2(%arg0: i32) -> (i32, i32) {
    %c0_i32 = arith.constant 0 : i32
    %c0_i32_0 = arith.constant 0 : i32
    %c0_i32_1 = arith.constant 0 : i32
    return %c0_i32, %c0_i32_0 : i32, i32
  }
  func.func @transform_3(%arg0: i32) -> (i32, i32) {
    %c0_i32 = arith.constant 0 : i32
    %c0_i32_0 = arith.constant 0 : i32
    return %arg0, %c0_i32 : i32, i32
  }
  func.func @transform_4(%arg0: i32) -> (i32, i32) {
    %c0_i32 = arith.constant 0 : i32
    %c0_i32_0 = arith.constant 0 : i32
    %c0_i32_1 = arith.constant 0 : i32
    return %c0_i32, %c0_i32_0 : i32, i32
  }
  func.func @transform_5(%arg0: i32) -> (i32, i32) {
    %c0_i32 = arith.constant 0 : i32
    %c0_i32_0 = arith.constant 0 : i32
    %c0_i32_1 = arith.constant 0 : i32
    return %c0_i32, %c0_i32_0 : i32, i32
  }
  func.func @transform_6(%arg0: i32) -> (i32, i32) {
    %c0_i32 = arith.constant 0 : i32
    %c0_i32_0 = arith.constant 0 : i32
    return %arg0, %c0_i32 : i32, i32
  }
}

</mosaic_0001>

<bundles_post_ra>
// kernel: tpu_custom_call.1
= control target key start
LH: loop header
LB: loop body
LE: loop exit
PB: predicated region body
PF: predicated region fallthrough
CT: control target
= control target key end

     0   :  { %11 = vsyncpa [#allocation3], 0  ;;  %s680_s0 = inlined_call_operand.hbm [shape: bf16[16,128], index: 0, kind: input, shape index: {}]   ;;  %s681_s1 = inlined_call_operand.hbm [shape: bf16[128,128], index: 1, kind: input, shape index: {}]   ;;  %s682_s2 = inlined_call_operand.vmem [shape: f32[1,128], index: 2, kind: input, shape index: {}]   ;;  %s683_s3 = inlined_call_operand.vmem [shape: bf16[16,128], index: 3, kind: input, shape index: {}]   ;;  %s684_s4 = inlined_call_operand.hbm [shape: bf16[128,128], index: 4, kind: input, shape index: {}]   ;;  %s685_s5 = inlined_call_operand.vmem [shape: f32[1,128], index: 5, kind: input, shape index: {}]   ;;  %s686_s6 = inlined_call_operand.hbm [shape: f32[16,128], index: 6, kind: output, shape index: {}]  }
   0x1   :  { %12 = vsyncpa [#allocation6], 0 }
   0x2   :  { %13 = vsyncpa [#allocation4], 0  ;;  %s562_s21 = smov [#allocation5]   ;;  %s563_s23 = smov [#allocation2]  }
   0x3   :  { %s31_s22 = sshll.u32 %s562_s21, 4  ;;  %s19_s24 = sshll.u32 %s563_s23, 4  ;;  %s32_s22 = int_to_ptr.vmem [resolvable:$true] %s31_s22  ;;  %s607_s24 = int_to_ptr.vmem [resolvable:$true] %s19_s24 }
   0x4   :  { %s468_s27 = scalar_lea.hbm %s681_s1, 1024 }
   0x5   :  { %p469_p0 = scmp.ne.s32.totalorder %s681_s1, %s468_s27  ;;  %p472_p1 = scmp.lt.u32.totalorder %s468_s27, %s681_s1 }
   0x7   :  { %p474_p2 = pnand %p472_p1, %p469_p0 }
   0x9   :  { %477 = shalt.err (!%p474_p2)
}
   0xa   :  { %s478_s8 = scalar_lea.vmem %s32_s22, 1024  ;;  %p483_p4 = scmp.lt.s32.totalorder %s32_s22, %s32_s22 }
   0xb   :  { %p479_p3 = scmp.ne.s32.totalorder %s32_s22, %s478_s8  ;;  %p484_p5 = scmp.lt.s32.totalorder %s478_s8, %s478_s8 }
   0xd   :  { %p485_p6 = por %p484_p5, %p483_p4 }
   0xf   :  { %p486_p7 = pnand %p485_p6, %p479_p3 }
  0x11   :  { %489 = shalt.err (!%p486_p7)
}
  0x12   :  { %s564_s9 = smov 64   ;;  %s565_s10 = smov 4  }
  0x13   :  { %37 = dma.hbm_to_vmem [thread:$0]  %s681_s1, 1024, %s32_s22, [#allocation6], %s564_s9, %s564_s9, %s565_s10  }
  0x14   :  { %s490_s15 = scalar_lea.hbm %s680_s0, 128 }
  0x15   :  { %p491_p8 = scmp.ne.s32.totalorder %s680_s0, %s490_s15  ;;  %p494_p9 = scmp.lt.u32.totalorder %s490_s15, %s680_s0 }
  0x17   :  { %p496_p10 = pnand %p494_p9, %p491_p8 }
  0x19   :  { %499 = shalt.err (!%p496_p10)
}
  0x1a   :  { %s500_s20 = scalar_lea.vmem %s607_s24, 128  ;;  %p505_p12 = scmp.lt.s32.totalorder %s607_s24, %s607_s24 }
  0x1b   :  { %p501_p11 = scmp.ne.s32.totalorder %s607_s24, %s500_s20  ;;  %p506_p13 = scmp.lt.s32.totalorder %s500_s20, %s500_s20 }
  0x1d   :  { %p507_p0 = por %p506_p13, %p505_p12 }
  0x1f   :  { %p508_p1 = pnand %p507_p0, %p501_p11 }
  0x21   :  { %511 = shalt.err (!%p508_p1)
}
  0x22   :  { %25 = dma.hbm_to_vmem [thread:$0]  %s680_s0, 128, %s607_s24, [#allocation3], %s564_s9, %s564_s9, %s565_s10  }
  0x23   :  { %s566_s22 = smov [#allocation7]   ;;  %s512_s27 = scalar_lea.hbm %s684_s4, 1024 }
  0x24   :  { %s47_s23 = sshll.u32 %s566_s22, 4  ;;  %p513_p2 = scmp.ne.s32.totalorder %s684_s4, %s512_s27  ;;  %s48_s23 = int_to_ptr.vmem [resolvable:$true] %s47_s23 }
  0x25   :  { %p516_p3 = scmp.lt.u32.totalorder %s512_s27, %s684_s4 }
  0x27   :  { %p518_p4 = pnand %p516_p3, %p513_p2 }
  0x29   :  { %521 = shalt.err (!%p518_p4)
}
  0x2a   :  { %s522_s8 = scalar_lea.vmem %s48_s23, 1024  ;;  %p527_p6 = scmp.lt.s32.totalorder %s48_s23, %s48_s23 }
  0x2b   :  { %p523_p5 = scmp.ne.s32.totalorder %s48_s23, %s522_s8  ;;  %p528_p7 = scmp.lt.s32.totalorder %s522_s8, %s522_s8 }
  0x2d   :  { %p529_p8 = por %p528_p7, %p527_p6 }
  0x2f   :  { %p530_p9 = pnand %p529_p8, %p523_p5 }
  0x31   :  { %533 = shalt.err (!%p530_p9)
}
  0x32   :  { %53 = dma.hbm_to_vmem [thread:$0]  %s684_s4, 1024, %s48_s23, [#allocation6], %s564_s9, %s564_s9, %s565_s10  }
  0x33   :  { %556 = dma.done.wait [#allocation3], 128  }
  0x34   :  { %557 = vsyncadd [#allocation3], 4294967168 }
  0x35   :  { %558 = dma.done.wait [#allocation6], 2048  }
  0x36   :  { %559 = vsyncadd [#allocation6], 4294965248  ;;  %v567_v0 = vmov 0.0   ;;  %vm568_vm0 = vmmov 0   ;;  %v443_v1 = vld [vmem:[#allocation5] sm:$0xff]   ;;  %v444_v2 = vld [vmem:[#allocation5 + $0x8] sm:$0xff]   ;;  %v309_v35 = vlaneseq }
  0x37   :  { %393 = vmatprep.subr.bf16.mxu0 %v567_v0  ;;  %409 = vmatprep.mubr.msk.bf16.mxu0 %vm568_vm0, %v567_v0  ;;  %v445_v3 = vld [vmem:[#allocation5 + $0x10] sm:$0xff]   ;;  %v452_v4 = vld [vmem:[#allocation7] sm:$0xff]   ;;  %v446_v5 = vld [vmem:[#allocation5 + $0x18] sm:$0xff]  }
  0x38   :  { %413 = vmatprep.subr.bf16.mxu1 %v567_v0  ;;  %429 = vmatprep.mubr.msk.bf16.mxu1 %vm568_vm0, %v567_v0  ;;  %v453_v6 = vld [vmem:[#allocation7 + $0x8] sm:$0xff]   ;;  %v447_v7 = vld [vmem:[#allocation5 + $0x20] sm:$0xff]   ;;  %v454_v8 = vld [vmem:[#allocation7 + $0x10] sm:$0xff]   ;;  %v310_v36 = vand.u32 127, %v309_v35 }
  0x39   :  { %394 = vmatpush3.bf16.msra.mxu0 %v443_v1  ;;  %414 = vmatpush3.bf16.msra.mxu1 %v452_v4  ;;  %v448_v9 = vld [vmem:[#allocation5 + $0x28] sm:$0xff]   ;;  %v455_v10 = vld [vmem:[#allocation7 + $0x18] sm:$0xff]   ;;  %v449_v11 = vld [vmem:[#allocation5 + $0x30] sm:$0xff]  }
  0x3a   :  { %395 = vmatprep.subr.bf16.mxu0 %v567_v0  ;;  %415 = vmatprep.subr.bf16.mxu1 %v567_v0  ;;  %v456_v12 = vld [vmem:[#allocation7 + $0x20] sm:$0xff]   ;;  %v450_v13 = vld [vmem:[#allocation5 + $0x38] sm:$0xff]   ;;  %v457_v15 = vld [vmem:[#allocation7 + $0x28] sm:$0xff]   ;;  %vm311_vm1 = vcmp.lt.s32.totalorder %v310_v36, 16 }
  0x3b   :  { %v451_v14 = vld [vmem:[#allocation2] sm:$0xff]   ;;  %v458_v16 = vld [vmem:[#allocation7 + $0x30] sm:$0xff]  }
  0x3c   :  { %v459_v17 = vld [vmem:[#allocation7 + $0x38] sm:$0xff]  }
  0x3d   :  { %396 = vmatpush3.bf16.msra.mxu0 %v444_v2  ;;  %416 = vmatpush3.bf16.msra.mxu1 %v453_v6  ;;  %v372_v18 = vld [vmem:[%s683_s3] sm:$0xff]  }
  0x3e   :  { %397 = vmatprep.subr.bf16.mxu0 %v567_v0  ;;  %417 = vmatprep.subr.bf16.mxu1 %v567_v0  ;;  %v352_v19 = vld [vmem:[%s682_s2] ss:$0 sm:$0xff]  ;;  %v373_v20 = vunpack.c.l.bf16 %v372_v18  ;;  %v374_v21 = vunpack.c.h.bf16 %v372_v18 }
  0x3f   :  { %v362_v37 = vld [vmem:[%s685_s5] ss:$0 sm:$0xff]  ;;  %s569_s5 = smov [#allocation8]  }
  0x40   :  { %v192_v27 = vmul.f32 2.0, %v373_v20  ;;  %v193_v29 = vmul.f32 2.0, %v374_v21  ;;  %s339_s12 = sshll.u32 %s569_s5, 4  ;;  %s340_s12 = int_to_ptr.vmem [resolvable:$true] %s339_s12 }
  0x41   :  { %398 = vmatpush3.bf16.msra.mxu0 %v445_v3  ;;  %418 = vmatpush3.bf16.msra.mxu1 %v454_v8  ;;  %s534_s13 = scalar_lea.vmem %s340_s12, 256  ;;  %p539_p11 = scmp.lt.s32.totalorder %s340_s12, %s340_s12 }
  0x42   :  { %399 = vmatprep.subr.bf16.mxu0 %v567_v0  ;;  %419 = vmatprep.subr.bf16.mxu1 %v567_v0  ;;  %p535_p10 = scmp.ne.s32.totalorder %s340_s12, %s534_s13  ;;  %p540_p12 = scmp.lt.s32.totalorder %s534_s13, %s534_s13 }
  0x44   :  { %p541_p13 = por %p540_p12, %p539_p11 }
  0x45   :  { %400 = vmatpush3.bf16.msra.mxu0 %v446_v5  ;;  %420 = vmatpush3.bf16.msra.mxu1 %v455_v10 }
  0x46   :  { %401 = vmatprep.subr.bf16.mxu0 %v567_v0  ;;  %421 = vmatprep.subr.bf16.mxu1 %v567_v0  ;;  %p542_p0 = pnand %p541_p13, %p535_p10 }
  0x49   :  { %402 = vmatpush3.bf16.msra.mxu0 %v447_v7  ;;  %422 = vmatpush3.bf16.msra.mxu1 %v456_v12 }
  0x4a   :  { %403 = vmatprep.subr.bf16.mxu0 %v567_v0  ;;  %423 = vmatprep.subr.bf16.mxu1 %v567_v0 }
  0x4d   :  { %404 = vmatpush3.bf16.msra.mxu0 %v448_v9  ;;  %424 = vmatpush3.bf16.msra.mxu1 %v457_v15 }
  0x4e   :  { %405 = vmatprep.subr.bf16.mxu0 %v567_v0  ;;  %425 = vmatprep.subr.bf16.mxu1 %v567_v0 }
  0x51   :  { %406 = vmatpush3.bf16.msra.mxu0 %v449_v11  ;;  %426 = vmatpush3.bf16.msra.mxu1 %v458_v16 }
  0x52   :  { %407 = vmatprep.subr.bf16.mxu0 %v567_v0  ;;  %427 = vmatprep.subr.bf16.mxu1 %v567_v0 }
  0x55   :  { %408 = vmatpush3.bf16.msra.mxu0 %v450_v13  ;;  %428 = vmatpush3.bf16.msra.mxu1 %v459_v17 }
  0x58   :  { %410 = vmatmul.mubr.bf16.vlgmr.msra.gmra.mrb[0].mxu0 %v451_v14 }
 0x12b   :  { %v179_v22 = vpop.f32.mrb[0].mxu0 }
 0x12c   :  { %v180_v23 = vadd.f32 %v352_v19, %v179_v22  ;;  %v411_v24 = vpop.f32.mrb[1].mxu0 }
 0x12d   :  { %v182_v25 = vpop.f32.mrb[2].mxu0 }
 0x12e   :  { %v186_v26 = vmax.f32 %v180_v23, 0.0  ;;  %v183_v28 = vadd.f32 %v352_v19, %v182_v25  ;;  %v412_v30 = vpop.f32.mrb[3].mxu0 }
 0x130   :  { %v187_v31 = vmax.f32 %v183_v28, 0.0  ;;  %v194_v32 = vmul.f32 %v192_v27, %v186_v26 }
 0x132   :  { %v195_v33 = vmul.f32 %v193_v29, %v187_v31 }
 0x134   :  { %v196_v34 = vpack.c.bf16 %v195_v33, %v194_v32 }
 0x136   :  { %430 = vmatmul.mubr.bf16.vlgmr.msra.gmra.mrb[0].mxu1 %v196_v34 }
 0x209   :  { %v302_v38 = vpop.f32.mrb[0].mxu1 }
 0x20a   :  { %v303_v39 = vadd.f32 %v362_v37, %v302_v38  ;;  %v431_v40 = vpop.f32.mrb[1].mxu1 }
 0x20b   :  { %v305_v41 = vpop.f32.mrb[2].mxu1 }
 0x20c   :  { %v306_v42 = vadd.f32 %v362_v37, %v305_v41  ;;  %v432_v43 = vpop.f32.mrb[3].mxu1  ;;  %v312_v44 = vsel %vm311_vm1, %v303_v39, -1e+30 }
 0x20d   :  { %314 = vmax.xlane.f32.xlu0 %v312_v44 }
 0x20e   :  { %v313_v45 = vsel %vm311_vm1, %v306_v42, -1e+30 }
 0x211   :  { %316 = vmax.xlane.f32.xlu0 %v313_v45 }
 0x29a   :  { %v315_v46 = vpop.xlane.xlu0 %314 }
 0x29b   :  { %v318_v47 = vsub.f32 %v312_v44, %v315_v46 }
 0x29d   :  { %v320_v48 = vmul.f32 1.442695, %v318_v47 }
 0x29e   :  { %v317_v49 = vpop.xlane.xlu0 %316 }
 0x29f   :  { %460 = vpow2.f32 %v320_v48  ;;  %v319_v50 = vsub.f32 %v313_v45, %v317_v49 }
 0x2a1   :  { %v322_v51 = vmul.f32 1.442695, %v319_v50 }
 0x2a3   :  { %462 = vpow2.f32 %v322_v51 }
 0x2a9   :  { %v461_v52 = vpop.eup %460 }
 0x2aa   :  { %324 = vadd.xlane.f32.xlu1 %v461_v52 }
 0x2ad   :  { %v463_v53 = vpop.eup %462 }
 0x2ae   :  { %326 = vadd.xlane.f32.xlu1 %v463_v53 }
 0x337   :  { %v325_v54 = vpop.xlane.xlu1 %324 }
 0x338   :  { %464 = vrcp.f32 %v325_v54 }
 0x33b   :  { %v327_v55 = vpop.xlane.xlu1 %326 }
 0x33c   :  { %466 = vrcp.f32 %v327_v55 }
 0x342   :  { %v465_v56 = vpop.eup %464 }
 0x343   :  { %v330_v57 = vmul.f32 %v465_v56, %v461_v52 }
 0x345   :  { %332 = vst [vmem:[#allocation8] sm:$0xff] %v330_v57 }
 0x346   :  { %v467_v58 = vpop.eup %466 }
 0x347   :  { %v331_v59 = vmul.f32 %v467_v58, %v463_v53 }
 0x349   :  { %333 = vst [vmem:[#allocation8 + $0x8] sm:$0xff] %v331_v59 }
 0x34a   :  { %545 = shalt.err (!%p542_p0)
}
 0x34b   :  { %s546_s16 = scalar_lea.hbm %s686_s6, 256 }
 0x34c   :  { %p547_p1 = scmp.ne.s32.totalorder %s686_s6, %s546_s16  ;;  %p550_p2 = scmp.lt.u32.totalorder %s546_s16, %s686_s6 }
 0x34e   :  { %p552_p3 = pnand %p550_p2, %p547_p1 }
 0x350   :  { %555 = shalt.err (!%p552_p3)
}
 0x351   :  { %s570_s1 = smov 128   ;;  %s571_s21 = smov 8  }
 0x352   :  { %345 = dma.vmem_to_hbm [thread:$0]  %s340_s12, 256, %s686_s6, [#allocation4], %s570_s1, %s570_s1, %s571_s21  }
 0x353   :  { %560 = dma.done.wait [#allocation4], 256  }
 0x354   :  { %561 = vsyncadd [#allocation4], 4294967040 }
 0x355   :  { %349 = vsyncpa [#allocation3], 1 }
 0x356   :  { %350 = vsyncpa [#allocation6], 1 }
 0x357   :  { %351 = vsyncpa [#allocation4], 1 }

// kernel: tpu_custom_call.1
= control target key start
LH: loop header
LB: loop body
LE: loop exit
PB: predicated region body
PF: predicated region fallthrough
CT: control target
= control target key end

     0   :  { %11 = vsyncpa [#allocation3], 0  ;;  %s680_s0 = inlined_call_operand.hbm [shape: bf16[16,128], index: 0, kind: input, shape index: {}]   ;;  %s681_s1 = inlined_call_operand.hbm [shape: bf16[128,128], index: 1, kind: input, shape index: {}]   ;;  %s682_s2 = inlined_call_operand.vmem [shape: f32[1,128], index: 2, kind: input, shape index: {}]   ;;  %s683_s3 = inlined_call_operand.vmem [shape: bf16[16,128], index: 3, kind: input, shape index: {}]   ;;  %s684_s4 = inlined_call_operand.hbm [shape: bf16[128,128], index: 4, kind: input, shape index: {}]   ;;  %s685_s5 = inlined_call_operand.vmem [shape: f32[1,128], index: 5, kind: input, shape index: {}]   ;;  %s686_s6 = inlined_call_operand.hbm [shape: f32[16,128], index: 6, kind: output, shape index: {}]  }
   0x1   :  { %12 = vsyncpa [#allocation6], 0 }
   0x2   :  { %13 = vsyncpa [#allocation4], 0  ;;  %s562_s21 = smov [#allocation5]   ;;  %s563_s23 = smov [#allocation2]  }
   0x3   :  { %s31_s22 = sshll.u32 %s562_s21, 4  ;;  %s19_s24 = sshll.u32 %s563_s23, 4  ;;  %s32_s22 = int_to_ptr.vmem [resolvable:$true] %s31_s22  ;;  %s607_s24 = int_to_ptr.vmem [resolvable:$true] %s19_s24 }
   0x4   :  { %s468_s27 = scalar_lea.hbm %s681_s1, 1024 }
   0x5   :  { %p469_p0 = scmp.ne.s32.totalorder %s681_s1, %s468_s27  ;;  %p472_p1 = scmp.lt.u32.totalorder %s468_s27, %s681_s1 }
   0x7   :  { %p474_p2 = pnand %p472_p1, %p469_p0 }
   0x9   :  { %477 = shalt.err (!%p474_p2)
}
   0xa   :  { %s478_s8 = scalar_lea.vmem %s32_s22, 1024  ;;  %p483_p4 = scmp.lt.s32.totalorder %s32_s22, %s32_s22 }
   0xb   :  { %p479_p3 = scmp.ne.s32.totalorder %s32_s22, %s478_s8  ;;  %p484_p5 = scmp.lt.s32.totalorder %s478_s8, %s478_s8 }
   0xd   :  { %p485_p6 = por %p484_p5, %p483_p4 }
   0xf   :  { %p486_p7 = pnand %p485_p6, %p479_p3 }
  0x11   :  { %489 = shalt.err (!%p486_p7)
}
  0x12   :  { %s564_s9 = smov 64   ;;  %s565_s10 = smov 4  }
  0x13   :  { %37 = dma.hbm_to_vmem [thread:$0]  %s681_s1, 1024, %s32_s22, [#allocation6], %s564_s9, %s564_s9, %s565_s10  }
  0x14   :  { %s490_s15 = scalar_lea.hbm %s680_s0, 128 }
  0x15   :  { %p491_p8 = scmp.ne.s32.totalorder %s680_s0, %s490_s15  ;;  %p494_p9 = scmp.lt.u32.totalorder %s490_s15, %s680_s0 }
  0x17   :  { %p496_p10 = pnand %p494_p9, %p491_p8 }
  0x19   :  { %499 = shalt.err (!%p496_p10)
}
  0x1a   :  { %s500_s20 = scalar_lea.vmem %s607_s24, 128  ;;  %p505_p12 = scmp.lt.s32.totalorder %s607_s24, %s607_s24 }
  0x1b   :  { %p501_p11 = scmp.ne.s32.totalorder %s607_s24, %s500_s20  ;;  %p506_p13 = scmp.lt.s32.totalorder %s500_s20, %s500_s20 }
  0x1d   :  { %p507_p0 = por %p506_p13, %p505_p12 }
  0x1f   :  { %p508_p1 = pnand %p507_p0, %p501_p11 }
  0x21   :  { %511 = shalt.err (!%p508_p1)
}
  0x22   :  { %25 = dma.hbm_to_vmem [thread:$0]  %s680_s0, 128, %s607_s24, [#allocation3], %s564_s9, %s564_s9, %s565_s10  }
  0x23   :  { %s566_s22 = smov [#allocation7]   ;;  %s512_s27 = scalar_lea.hbm %s684_s4, 1024 }
  0x24   :  { %s47_s23 = sshll.u32 %s566_s22, 4  ;;  %p513_p2 = scmp.ne.s32.totalorder %s684_s4, %s512_s27  ;;  %s48_s23 = int_to_ptr.vmem [resolvable:$true] %s47_s23 }
  0x25   :  { %p516_p3 = scmp.lt.u32.totalorder %s512_s27, %s684_s4 }
  0x27   :  { %p518_p4 = pnand %p516_p3, %p513_p2 }
  0x29   :  { %521 = shalt.err (!%p518_p4)
}
  0x2a   :  { %s522_s8 = scalar_lea.vmem %s48_s23, 1024  ;;  %p527_p6 = scmp.lt.s32.totalorder %s48_s23, %s48_s23 }
  0x2b   :  { %p523_p5 = scmp.ne.s32.totalorder %s48_s23, %s522_s8  ;;  %p528_p7 = scmp.lt.s32.totalorder %s522_s8, %s522_s8 }
  0x2d   :  { %p529_p8 = por %p528_p7, %p527_p6 }
  0x2f   :  { %p530_p9 = pnand %p529_p8, %p523_p5 }
  0x31   :  { %533 = shalt.err (!%p530_p9)
}
  0x32   :  { %53 = dma.hbm_to_vmem [thread:$0]  %s684_s4, 1024, %s48_s23, [#allocation6], %s564_s9, %s564_s9, %s565_s10  }
  0x33   :  { %556 = dma.done.wait [#allocation3], 128  }
  0x34   :  { %557 = vsyncadd [#allocation3], 4294967168 }
  0x35   :  { %558 = dma.done.wait [#allocation6], 2048  }
  0x36   :  { %559 = vsyncadd [#allocation6], 4294965248  ;;  %v567_v0 = vmov 0.0   ;;  %vm568_vm0 = vmmov 0   ;;  %v443_v1 = vld [vmem:[#allocation5] sm:$0xff]   ;;  %v444_v2 = vld [vmem:[#allocation5 + $0x8] sm:$0xff]   ;;  %v309_v35 = vlaneseq }
  0x37   :  { %393 = vmatprep.subr.bf16.mxu0 %v567_v0  ;;  %409 = vmatprep.mubr.msk.bf16.mxu0 %vm568_vm0, %v567_v0  ;;  %v445_v3 = vld [vmem:[#allocation5 + $0x10] sm:$0xff]   ;;  %v452_v4 = vld [vmem:[#allocation7] sm:$0xff]   ;;  %v446_v5 = vld [vmem:[#allocation5 + $0x18] sm:$0xff]  }
  0x38   :  { %413 = vmatprep.subr.bf16.mxu1 %v567_v0  ;;  %429 = vmatprep.mubr.msk.bf16.mxu1 %vm568_vm0, %v567_v0  ;;  %v453_v6 = vld [vmem:[#allocation7 + $0x8] sm:$0xff]   ;;  %v447_v7 = vld [vmem:[#allocation5 + $0x20] sm:$0xff]   ;;  %v454_v8 = vld [vmem:[#allocation7 + $0x10] sm:$0xff]   ;;  %v310_v36 = vand.u32 127, %v309_v35 }
  0x39   :  { %394 = vmatpush3.bf16.msra.mxu0 %v443_v1  ;;  %414 = vmatpush3.bf16.msra.mxu1 %v452_v4  ;;  %v448_v9 = vld [vmem:[#allocation5 + $0x28] sm:$0xff]   ;;  %v455_v10 = vld [vmem:[#allocation7 + $0x18] sm:$0xff]   ;;  %v449_v11 = vld [vmem:[#allocation5 + $0x30] sm:$0xff]  }
  0x3a   :  { %395 = vmatprep.subr.bf16.mxu0 %v567_v0  ;;  %415 = vmatprep.subr.bf16.mxu1 %v567_v0  ;;  %v456_v12 = vld [vmem:[#allocation7 + $0x20] sm:$0xff]   ;;  %v450_v13 = vld [vmem:[#allocation5 + $0x38] sm:$0xff]   ;;  %v457_v15 = vld [vmem:[#allocation7 + $0x28] sm:$0xff]   ;;  %vm311_vm1 = vcmp.lt.s32.totalorder %v310_v36, 16 }
  0x3b   :  { %v451_v14 = vld [vmem:[#allocation2] sm:$0xff]   ;;  %v458_v16 = vld [vmem:[#allocation7 + $0x30] sm:$0xff]  }
  0x3c   :  { %v459_v17 = vld [vmem:[#allocation7 + $0x38] sm:$0xff]  }
  0x3d   :  { %396 = vmatpush3.bf16.msra.mxu0 %v444_v2  ;;  %416 = vmatpush3.bf16.msra.mxu1 %v453_v6  ;;  %v372_v18 = vld [vmem:[%s683_s3] sm:$0xff]  }
  0x3e   :  { %397 = vmatprep.subr.bf16.mxu0 %v567_v0  ;;  %417 = vmatprep.subr.bf16.mxu1 %v567_v0  ;;  %v352_v19 = vld [vmem:[%s682_s2] ss:$0 sm:$0xff]  ;;  %v373_v20 = vunpack.c.l.bf16 %v372_v18  ;;  %v374_v21 = vunpack.c.h.bf16 %v372_v18 }
  0x3f   :  { %v362_v37 = vld [vmem:[%s685_s5] ss:$0 sm:$0xff]  ;;  %s569_s5 = smov [#allocation8]  }
  0x40   :  { %v192_v27 = vmul.f32 2.0, %v373_v20  ;;  %v193_v29 = vmul.f32 2.0, %v374_v21  ;;  %s339_s12 = sshll.u32 %s569_s5, 4  ;;  %s340_s12 = int_to_ptr.vmem [resolvable:$true] %s339_s12 }
  0x41   :  { %398 = vmatpush3.bf16.msra.mxu0 %v445_v3  ;;  %418 = vmatpush3.bf16.msra.mxu1 %v454_v8  ;;  %s534_s13 = scalar_lea.vmem %s340_s12, 256  ;;  %p539_p11 = scmp.lt.s32.totalorder %s340_s12, %s340_s12 }
  0x42   :  { %399 = vmatprep.subr.bf16.mxu0 %v567_v0  ;;  %419 = vmatprep.subr.bf16.mxu1 %v567_v0  ;;  %p535_p10 = scmp.ne.s32.totalorder %s340_s12, %s534_s13  ;;  %p540_p12 = scmp.lt.s32.totalorder %s534_s13, %s534_s13 }
  0x44   :  { %p541_p13 = por %p540_p12, %p539_p11 }
  0x45   :  { %400 = vmatpush3.bf16.msra.mxu0 %v446_v5  ;;  %420 = vmatpush3.bf16.msra.mxu1 %v455_v10 }
  0x46   :  { %401 = vmatprep.subr.bf16.mxu0 %v567_v0  ;;  %421 = vmatprep.subr.bf16.mxu1 %v567_v0  ;;  %p542_p0 = pnand %p541_p13, %p535_p10 }
  0x49   :  { %402 = vmatpush3.bf16.msra.mxu0 %v447_v7  ;;  %422 = vmatpush3.bf16.msra.mxu1 %v456_v12 }
  0x4a   :  { %403 = vmatprep.subr.bf16.mxu0 %v567_v0  ;;  %423 = vmatprep.subr.bf16.mxu1 %v567_v0 }
  0x4d   :  { %404 = vmatpush3.bf16.msra.mxu0 %v448_v9  ;;  %424 = vmatpush3.bf16.msra.mxu1 %v457_v15 }
  0x4e   :  { %405 = vmatprep.subr.bf16.mxu0 %v567_v0  ;;  %425 = vmatprep.subr.bf16.mxu1 %v567_v0 }
  0x51   :  { %406 = vmatpush3.bf16.msra.mxu0 %v449_v11  ;;  %426 = vmatpush3.bf16.msra.mxu1 %v458_v16 }
  0x52   :  { %407 = vmatprep.subr.bf16.mxu0 %v567_v0  ;;  %427 = vmatprep.subr.bf16.mxu1 %v567_v0 }
  0x55   :  { %408 = vmatpush3.bf16.msra.mxu0 %v450_v13  ;;  %428 = vmatpush3.bf16.msra.mxu1 %v459_v17 }
  0x58   :  { %410 = vmatmul.mubr.bf16.vlgmr.msra.gmra.mrb[0].mxu0 %v451_v14 }
 0x12b   :  { %v179_v22 = vpop.f32.mrb[0].mxu0 }
 0x12c   :  { %v180_v23 = vadd.f32 %v352_v19, %v179_v22  ;;  %v411_v24 = vpop.f32.mrb[1].mxu0 }
 0x12d   :  { %v182_v25 = vpop.f32.mrb[2].mxu0 }
 0x12e   :  { %v186_v26 = vmax.f32 %v180_v23, 0.0  ;;  %v183_v28 = vadd.f32 %v352_v19, %v182_v25  ;;  %v412_v30 = vpop.f32.mrb[3].mxu0 }
 0x130   :  { %v187_v31 = vmax.f32 %v183_v28, 0.0  ;;  %v194_v32 = vmul.f32 %v192_v27, %v186_v26 }
 0x132   :  { %v195_v33 = vmul.f32 %v193_v29, %v187_v31 }
 0x134   :  { %v196_v34 = vpack.c.bf16 %v195_v33, %v194_v32 }
 0x136   :  { %430 = vmatmul.mubr.bf16.vlgmr.msra.gmra.mrb[0].mxu1 %v196_v34 }
 0x209   :  { %v302_v38 = vpop.f32.mrb[0].mxu1 }
 0x20a   :  { %v303_v39 = vadd.f32 %v362_v37, %v302_v38  ;;  %v431_v40 = vpop.f32.mrb[1].mxu1 }
 0x20b   :  { %v305_v41 = vpop.f32.mrb[2].mxu1 }
 0x20c   :  { %v306_v42 = vadd.f32 %v362_v37, %v305_v41  ;;  %v432_v43 = vpop.f32.mrb[3].mxu1  ;;  %v312_v44 = vsel %vm311_vm1, %v303_v39, -1e+30 }
 0x20d   :  { %314 = vmax.xlane.f32.xlu0 %v312_v44 }
 0x20e   :  { %v313_v45 = vsel %vm311_vm1, %v306_v42, -1e+30 }
 0x211   :  { %316 = vmax.xlane.f32.xlu0 %v313_v45 }
 0x29a   :  { %v315_v46 = vpop.xlane.xlu0 %314 }
 0x29b   :  { %v318_v47 = vsub.f32 %v312_v44, %v315_v46 }
 0x29d   :  { %v320_v48 = vmul.f32 1.442695, %v318_v47 }
 0x29e   :  { %v317_v49 = vpop.xlane.xlu0 %316 }
 0x29f   :  { %460 = vpow2.f32 %v320_v48  ;;  %v319_v50 = vsub.f32 %v313_v45, %v317_v49 }
 0x2a1   :  { %v322_v51 = vmul.f32 1.442695, %v319_v50 }
 0x2a3   :  { %462 = vpow2.f32 %v322_v51 }
 0x2a9   :  { %v461_v52 = vpop.eup %460 }
 0x2aa   :  { %324 = vadd.xlane.f32.xlu1 %v461_v52 }
 0x2ad   :  { %v463_v53 = vpop.eup %462 }
 0x2ae   :  { %326 = vadd.xlane.f32.xlu1 %v463_v53 }
 0x337   :  { %v325_v54 = vpop.xlane.xlu1 %324 }
 0x338   :  { %464 = vrcp.f32 %v325_v54 }
 0x33b   :  { %v327_v55 = vpop.xlane.xlu1 %326 }
 0x33c   :  { %466 = vrcp.f32 %v327_v55 }
 0x342   :  { %v465_v56 = vpop.eup %464 }
 0x343   :  { %v330_v57 = vmul.f32 %v465_v56, %v461_v52 }
 0x345   :  { %332 = vst [vmem:[#allocation8] sm:$0xff] %v330_v57 }
 0x346   :  { %v467_v58 = vpop.eup %466 }
 0x347   :  { %v331_v59 = vmul.f32 %v467_v58, %v463_v53 }
 0x349   :  { %333 = vst [vmem:[#allocation8 + $0x8] sm:$0xff] %v331_v59 }
 0x34a   :  { %545 = shalt.err (!%p542_p0)
}
 0x34b   :  { %s546_s16 = scalar_lea.hbm %s686_s6, 256 }
 0x34c   :  { %p547_p1 = scmp.ne.s32.totalorder %s686_s6, %s546_s16  ;;  %p550_p2 = scmp.lt.u32.totalorder %s546_s16, %s686_s6 }
 0x34e   :  { %p552_p3 = pnand %p550_p2, %p547_p1 }
 0x350   :  { %555 = shalt.err (!%p552_p3)
}
 0x351   :  { %s570_s1 = smov 128   ;;  %s571_s21 = smov 8  }
 0x352   :  { %345 = dma.vmem_to_hbm [thread:$0]  %s340_s12, 256, %s686_s6, [#allocation4], %s570_s1, %s570_s1, %s571_s21  }
 0x353   :  { %560 = dma.done.wait [#allocation4], 256  }
 0x354   :  { %561 = vsyncadd [#allocation4], 4294967040 }
 0x355   :  { %349 = vsyncpa [#allocation3], 1 }
 0x356   :  { %350 = vsyncpa [#allocation6], 1 }
 0x357   :  { %351 = vsyncpa [#allocation4], 1 }

</bundles_post_ra>
